<compile_context>
chip_gen: v6e
topology: v6e:2x2x1
jax: 0.10.0
libtpu: 0.0.40
codegen_flags: <defaults>
</compile_context>

<pallas_src>
import jax
import jax.numpy as jnp
from jax.experimental import pallas as pl
from jax.experimental.pallas import tpu as pltpu


def _round_up(n: int, m: int) -> int:
    return ((n + m - 1) // m) * m


def valuenet_kernel(xp_ref, j_ref, w1_ref, b1_ref, w2_ref, b2_ref, o_ref):
    """Fused LayerNorm + MLP value head on one lane-packed batch tile.

    xp_ref: (TBp, L)        lane-packed inputs: row r holds `pack` logical rows,
                            lanes [j*D:(j+1)*D] = features of logical row r*pack+j
    j_ref:  (L, L)          block-diagonal ones/D (LN mean operator + broadcast)
    w1_ref: (L, pack*H)     block-diagonal, gamma-folded first Linear weight
    b1_ref: (1, pack*H)     tiled folded first Linear bias (beta@w1 + b1)
    w2_ref: (pack*H, pack)  block-diagonal second Linear weight
    b2_ref: (1, 1)          second Linear bias
    o_ref:  (TBp, pack)     values; column j = value of logical row r*pack+j
    """
    x = xp_ref[...].astype(jnp.float32)
    j = j_ref[...]

    # LayerNorm statistics on the MXU: the block-diagonal ones/D matmul yields each
    # logical row's mean broadcast across that row's own D-lane block.
    mean = jnp.dot(x, j, preferred_element_type=jnp.float32)
    c = x - mean
    var = jnp.dot(c * c, j, preferred_element_type=jnp.float32)
    xhat = c * jax.lax.rsqrt(var + 1e-5)  # eps=1e-5: PyTorch LayerNorm default

    # (gamma * xhat + beta) @ w1 + b1, with the LN affine pre-folded into w1/b1.
    h = jnp.dot(xhat, w1_ref[...], preferred_element_type=jnp.float32) + b1_ref[...]
    h = jnp.maximum(h, 0.0)

    # Linear(H -> 1) per logical row via the block-diagonal (pack*H, pack) weight.
    out = jnp.dot(h, w2_ref[...], preferred_element_type=jnp.float32) + b2_ref[...]
    o_ref[...] = out.astype(o_ref.dtype)


def value_net_forward(x, gamma, beta, w1, b1, w2, b2, *, block_b=None):
    """ValueNet forward. x: (B, D) f32. Returns (B,) f32 (matches .squeeze(-1))."""
    B, D = x.shape
    H = w1.shape[1]

    # Pack `pack` logical rows per 128-lane vreg row (full lane density when D
    # divides 128; otherwise fall back to one row per vreg row, still correct).
    pack = 128 // D if (D <= 128 and 128 % D == 0) else 1
    L = pack * D
    row_align = 8 * pack  # sublane (8) alignment of the packed batch tile

    if block_b is None:
        # <=4096 rows per tile (bounded VMEM, more pipeline steps) and at least
        # 2 grid steps whenever B allows it so both v7x TensorCores get work.
        block_b = min(4096, _round_up(max(-(-B // 2), row_align), row_align))
    else:
        block_b = _round_up(max(int(block_b), row_align), row_align)

    b_pad = _round_up(B, block_b)
    if b_pad != B:
        # Zero rows stay finite through LayerNorm (var=0, eps>0) and are sliced off.
        x = jnp.pad(x, ((0, b_pad - B), (0, 0)))

    xp = x.reshape(b_pad // pack, L)  # free, contiguous-in-HBM lane-packing reshape
    num_tiles = b_pad // block_b
    tbp = block_b // pack

    f32 = jnp.float32
    eye_p = jnp.eye(pack, dtype=f32)
    # Block-diagonal LN-mean operator (also broadcasts stats back to each block).
    j_mat = jnp.kron(eye_p, jnp.full((D, D), 1.0 / D, dtype=f32))
    # Fold the LayerNorm affine into the first Linear: y@w1 + b1 == xhat@w1' + b1'.
    w1f = gamma.astype(f32)[:, None] * w1.astype(f32)          # (D, H)
    b1f = beta.astype(f32) @ w1.astype(f32) + b1.astype(f32)   # (H,)
    w1_block = jnp.kron(eye_p, w1f)                            # (L, pack*H)
    b1_block = jnp.tile(b1f, pack).reshape(1, pack * H)        # (1, pack*H)
    w2_block = jnp.kron(eye_p, w2.astype(f32))                 # (pack*H, pack)
    b2_mat = b2.astype(f32).reshape(1, 1)

    out = pl.pallas_call(
        valuenet_kernel,
        out_shape=jax.ShapeDtypeStruct((b_pad // pack, pack), f32),
        grid=(num_tiles,),
        in_specs=[
            pl.BlockSpec((tbp, L), lambda i: (i, 0)),          # x: tiled over batch
            pl.BlockSpec((L, L), lambda i: (0, 0)),            # LN operator: resident
            pl.BlockSpec((L, pack * H), lambda i: (0, 0)),     # w1 block:    resident
            pl.BlockSpec((1, pack * H), lambda i: (0, 0)),     # b1 block:    resident
            pl.BlockSpec((pack * H, pack), lambda i: (0, 0)),  # w2 block:    resident
            pl.BlockSpec((1, 1), lambda i: (0, 0)),            # b2:          resident
        ],
        out_specs=pl.BlockSpec((tbp, pack), lambda i: (i, 0)),
        compiler_params=pltpu.CompilerParams(
            dimension_semantics=("parallel",),  # megacore split over batch tiles
        ),
    )(xp, j_mat, w1_block, b1_block, w2_block, b2_mat)

    return out.reshape(b_pad)[:B]  # squeeze(-1) + drop padded rows


def init_params(key, state_dim, hidden):
    """Init matching the PyTorch module:
    LayerNorm: weight=1, bias=0.
    Linear: kaiming_uniform_(nonlinearity='relu') -> U(-b, b), b = sqrt(6 / fan_in); bias = 0.
    Linear weights stored as (in_dim, out_dim) (transposed vs PyTorch)."""
    k1, k2 = jax.random.split(key)
    gamma = jnp.ones((state_dim,), jnp.float32)
    beta = jnp.zeros((state_dim,), jnp.float32)

    bound1 = (6.0 / state_dim) ** 0.5
    w1 = jax.random.uniform(k1, (state_dim, hidden), jnp.float32, -bound1, bound1)
    b1 = jnp.zeros((hidden,), jnp.float32)

    bound2 = (6.0 / hidden) ** 0.5
    w2 = jax.random.uniform(k2, (hidden, 1), jnp.float32, -bound2, bound2)
    b2 = jnp.zeros((1,), jnp.float32)

    return gamma, beta, w1, b1, w2, b2


def reference_forward(x, gamma, beta, w1, b1, w2, b2):
    """Pure-JAX reference (unfused form) for correctness checking."""
    mean = jnp.mean(x, axis=-1, keepdims=True)
    var = jnp.mean((x - mean) ** 2, axis=-1, keepdims=True)
    y = (x - mean) / jnp.sqrt(var + 1e-5) * gamma + beta
    h = jnp.maximum(y @ w1 + b1, 0.0)
    return (h @ w2 + b2)[:, 0]


if __name__ == "__main__":
    state_dim = 16
    hidden = 32

    key = jax.random.PRNGKey(0)
    kx, kp, kx2 = jax.random.split(key, 3)
    params = init_params(kp, state_dim, hidden)

    # Small single-tile case (exercises batch padding inside a packed vreg row).
    x = jax.random.normal(kx, (8, state_dim), jnp.float32)
    out = jax.block_until_ready(value_net_forward(x, *params))
    ref = reference_forward(x, *params)
    assert out.shape == (8,), out.shape
    assert jnp.allclose(out, ref, atol=1e-4, rtol=1e-4), float(
        jnp.max(jnp.abs(out - ref))
    )

    # Multi-tile case with the default tile selection: B=2500 -> block_b=1280,
    # 2 grid steps (megacore-friendly), resident weights, padded last tile.
    x2 = jax.random.normal(kx2, (2500, state_dim), jnp.float32)
    out2 = jax.block_until_ready(value_net_forward(x2, *params))
    ref2 = reference_forward(x2, *params)
    assert out2.shape == (2500,), out2.shape
    assert jnp.allclose(out2, ref2, atol=1e-4, rtol=1e-4), float(
        jnp.max(jnp.abs(out2 - ref2))
    )

    print("KERNEL_OK")
</pallas_src>

<mosaic_0001>
module attributes {stable_mosaic.version = 11 : i64} {
  func.func @valuenet_kernel(%arg0: i32, %arg1: memref<8x128xf32, #tpu.memory_space<vmem>>, %arg2: memref<128x128xf32, #tpu.memory_space<vmem>>, %arg3: memref<128x256xf32, #tpu.memory_space<vmem>>, %arg4: memref<1x256xf32, #tpu.memory_space<vmem>>, %arg5: memref<256x8xf32, #tpu.memory_space<vmem>>, %arg6: memref<1x1xf32, #tpu.memory_space<vmem>>, %arg7: memref<8x8xf32, #tpu.memory_space<vmem>>) attributes {dimension_semantics = [#tpu.dimension_semantics<parallel>], iteration_bounds = array<i64: 1>, scalar_prefetch = 0 : i64, scratch_operands = 0 : i64, tpu.core_type = #tpu.core_type<tc>, window_params = [{transform_indices = @transform_0, window_bounds = array<i64: 8, 128>}, {pipeline_mode = #tpu.pipeline_mode<synchronous>, transform_indices = @transform_1, window_bounds = array<i64: 128, 128>}, {pipeline_mode = #tpu.pipeline_mode<synchronous>, transform_indices = @transform_2, window_bounds = array<i64: 128, 256>}, {pipeline_mode = #tpu.pipeline_mode<synchronous>, transform_indices = @transform_3, window_bounds = array<i64: 1, 256>}, {pipeline_mode = #tpu.pipeline_mode<synchronous>, transform_indices = @transform_4, window_bounds = array<i64: 256, 8>}, {pipeline_mode = #tpu.pipeline_mode<synchronous>, transform_indices = @transform_5, window_bounds = array<i64: 1, 1>}, {transform_indices = @transform_6, window_bounds = array<i64: 8, 8>}]} {
    %c0 = arith.constant 0 : index
    %c0_0 = arith.constant 0 : index
    %0 = vector.load %arg1[%c0, %c0_0] : memref<8x128xf32, #tpu.memory_space<vmem>>, vector<8x128xf32>
    %c0_1 = arith.constant 0 : index
    %c0_2 = arith.constant 0 : index
    %1 = vector.load %arg2[%c0_1, %c0_2] : memref<128x128xf32, #tpu.memory_space<vmem>>, vector<128x128xf32>
    %cst = arith.constant dense<0.000000e+00> : vector<8x128xf32>
    %2 = tpu.matmul %0, %1, %cst {dimension_numbers = #tpu.dot_dimension_numbers<[1], [0], [0], [1], [0, 0, 1, 1], [], []>} : vector<8x128xf32>, vector<128x128xf32>, vector<8x128xf32> -> vector<8x128xf32>
    %3 = arith.subf %0, %2 : vector<8x128xf32>
    %4 = arith.mulf %3, %3 : vector<8x128xf32>
    %cst_3 = arith.constant dense<0.000000e+00> : vector<8x128xf32>
    %5 = tpu.matmul %4, %1, %cst_3 {dimension_numbers = #tpu.dot_dimension_numbers<[1], [0], [0], [1], [0, 0, 1, 1], [], []>} : vector<8x128xf32>, vector<128x128xf32>, vector<8x128xf32> -> vector<8x128xf32>
    %cst_4 = arith.constant 9.99999974E-6 : f32
    %6 = vector.broadcast %cst_4 : f32 to vector<8x128xf32>
    %7 = arith.addf %5, %6 : vector<8x128xf32>
    %8 = math.rsqrt %7 : vector<8x128xf32>
    %9 = arith.mulf %3, %8 : vector<8x128xf32>
    %c0_5 = arith.constant 0 : index
    %c0_6 = arith.constant 0 : index
    %10 = vector.load %arg3[%c0_5, %c0_6] : memref<128x256xf32, #tpu.memory_space<vmem>>, vector<128x256xf32>
    %cst_7 = arith.constant dense<0.000000e+00> : vector<8x256xf32>
    %11 = tpu.matmul %9, %10, %cst_7 {dimension_numbers = #tpu.dot_dimension_numbers<[1], [0], [0], [1], [0, 0, 1, 1], [], []>} : vector<8x128xf32>, vector<128x256xf32>, vector<8x256xf32> -> vector<8x256xf32>
    %c0_8 = arith.constant 0 : index
    %c0_9 = arith.constant 0 : index
    %12 = vector.load %arg4[%c0_8, %c0_9] : memref<1x256xf32, #tpu.memory_space<vmem>>, vector<1x256xf32>
    %13 = vector.broadcast %12 : vector<1x256xf32> to vector<8x256xf32>
    %14 = arith.addf %11, %13 : vector<8x256xf32>
    %cst_10 = arith.constant 0.000000e+00 : f32
    %15 = vector.broadcast %cst_10 : f32 to vector<8x256xf32>
    %16 = arith.maximumf %14, %15 : vector<8x256xf32>
    %c0_11 = arith.constant 0 : index
    %c0_12 = arith.constant 0 : index
    %17 = vector.load %arg5[%c0_11, %c0_12] : memref<256x8xf32, #tpu.memory_space<vmem>>, vector<256x8xf32>
    %cst_13 = arith.constant dense<0.000000e+00> : vector<8x8xf32>
    %18 = tpu.matmul %16, %17, %cst_13 {dimension_numbers = #tpu.dot_dimension_numbers<[1], [0], [0], [1], [0, 0, 1, 1], [], []>} : vector<8x256xf32>, vector<256x8xf32>, vector<8x8xf32> -> vector<8x8xf32>
    %c0_14 = arith.constant 0 : index
    %c0_15 = arith.constant 0 : index
    %19 = vector.load %arg6[%c0_14, %c0_15] : memref<1x1xf32, #tpu.memory_space<vmem>>, vector<1x1xf32>
    %20 = vector.broadcast %19 : vector<1x1xf32> to vector<8x8xf32>
    %21 = arith.addf %18, %20 : vector<8x8xf32>
    %c0_16 = arith.constant 0 : index
    %c0_17 = arith.constant 0 : index
    %22 = vector.load %arg7[%c0_16, %c0_17] : memref<8x8xf32, #tpu.memory_space<vmem>>, vector<8x8xf32>
    tpu.vector_store %arg7[%c0_16, %c0_17], %21 {strides = array<i32>} : memref<8x8xf32, #tpu.memory_space<vmem>>, vector<8x8xf32>,
    return
  }
  func.func @transform_0(%arg0: i32) -> (i32, i32) {
    %c0_i32 = arith.constant 0 : i32
    %c0_i32_0 = arith.constant 0 : i32
    return %arg0, %c0_i32 : i32, i32
  }
  func.func @transform_1(%arg0: i32) -> (i32, i32) {
    %c0_i32 = arith.constant 0 : i32
    %c0_i32_0 = arith.constant 0 : i32
    %c0_i32_1 = arith.constant 0 : i32
    return %c0_i32, %c0_i32_0 : i32, i32
  }
  func.func @transform_2(%arg0: i32) -> (i32, i32) {
    %c0_i32 = arith.constant 0 : i32
    %c0_i32_0 = arith.constant 0 : i32
    %c0_i32_1 = arith.constant 0 : i32
    return %c0_i32, %c0_i32_0 : i32, i32
  }
  func.func @transform_3(%arg0: i32) -> (i32, i32) {
    %c0_i32 = arith.constant 0 : i32
    %c0_i32_0 = arith.constant 0 : i32
    %c0_i32_1 = arith.constant 0 : i32
    return %c0_i32, %c0_i32_0 : i32, i32
  }
  func.func @transform_4(%arg0: i32) -> (i32, i32) {
    %c0_i32 = arith.constant 0 : i32
    %c0_i32_0 = arith.constant 0 : i32
    %c0_i32_1 = arith.constant 0 : i32
    return %c0_i32, %c0_i32_0 : i32, i32
  }
  func.func @transform_5(%arg0: i32) -> (i32, i32) {
    %c0_i32 = arith.constant 0 : i32
    %c0_i32_0 = arith.constant 0 : i32
    %c0_i32_1 = arith.constant 0 : i32
    return %c0_i32, %c0_i32_0 : i32, i32
  }
  func.func @transform_6(%arg0: i32) -> (i32, i32) {
    %c0_i32 = arith.constant 0 : i32
    %c0_i32_0 = arith.constant 0 : i32
    return %arg0, %c0_i32 : i32, i32
  }
}

</mosaic_0001>

<bundles_post_ra>
// kernel: tpu_custom_call.1
= control target key start
LH: loop header
LB: loop body
LE: loop exit
PB: predicated region body
PF: predicated region fallthrough
CT: control target
= control target key end

     0   :  { %s930_s0 = inlined_call_operand.vmem [shape: f32[8,128], index: 0, kind: input, shape index: {}]   ;;  %s931_s1 = inlined_call_operand.hbm [shape: f32[128,128], index: 1, kind: input, shape index: {}]   ;;  %s932_s2 = inlined_call_operand.vmem [shape: f32[128,256], index: 2, kind: input, shape index: {}]   ;;  %s933_s3 = inlined_call_operand.vmem [shape: f32[1,256], index: 3, kind: input, shape index: {}]   ;;  %s934_s4 = inlined_call_operand.vmem [shape: f32[256,8], index: 4, kind: input, shape index: {}]   ;;  %s935_s5 = inlined_call_operand.<no memory space> [shape: f32[1,1], index: 5, kind: input, shape index: {}]   ;;  %s936_s6 = inlined_call_operand.hbm [shape: f32[8,8], index: 6, kind: output, shape index: {}]  }
   0x1   :  { %v11_v0 = vstv %s935_s5 }
   0x2   :  { %12 = vst [vmem:[#allocation2] sm:$0x1] %v11_v0 }
   0x3   :  { %13 = vsyncpa [#allocation4], 0 }
   0x4   :  { %14 = vsyncpa [#allocation5], 0  ;;  %s641_s23 = smov [#allocation3]  }
   0x5   :  { %s22_s24 = sshll.u32 %s641_s23, 4  ;;  %s23_s24 = int_to_ptr.vmem [resolvable:$true] %s22_s24 }
   0x6   :  { %s605_s25 = scalar_lea.vmem %s23_s24, 2048  ;;  %p610_p1 = scmp.lt.s32.totalorder %s23_s24, %s23_s24 }
   0x7   :  { %p606_p0 = scmp.ne.s32.totalorder %s23_s24, %s605_s25  ;;  %p611_p2 = scmp.lt.s32.totalorder %s605_s25, %s605_s25 }
   0x9   :  { %p612_p3 = por %p611_p2, %p610_p1 }
   0xb   :  { %p613_p4 = pnand %p612_p3, %p606_p0 }
   0xd   :  { %616 = shalt.err (!%p613_p4)
}
   0xe   :  { %s642_s26 = smov 128   ;;  %s643_s27 = smov 8  }
   0xf   :  { %28 = dma.hbm_to_vmem [thread:$0]  %s931_s1, 2048, %s23_s24, [#allocation4], %s642_s26, %s642_s26, %s643_s27  }
  0x10   :  { %637 = dma.done.wait [#allocation4], 2048  }
  0x11   :  { %638 = vsyncadd [#allocation4], 4294965248  ;;  %v644_v1 = vmov 0.0   ;;  %vm645_vm0 = vmmov 0   ;;  %v56_v2 = vld [vmem:[#allocation3 + $0x78] sm:$0xff]  ;;  %v55_v3 = vld [vmem:[#allocation3 + $0x70] sm:$0xff] }
  0x12   :  { %517 = vmatprep.subr.mxu0 %v644_v1  ;;  %549 = vmatprep.mubr.msk.f32.mxu0 %vm645_vm0, %v644_v1  ;;  %v54_v4 = vld [vmem:[#allocation3 + $0x68] sm:$0xff]  ;;  %v53_v5 = vld [vmem:[#allocation3 + $0x60] sm:$0xff]  ;;  %v52_v6 = vld [vmem:[#allocation3 + $0x58] sm:$0xff]  ;;  %vm430_vm1 = vcmask 64512  }
  0x13   :  { %552 = vmatprep.subr.mxu1 %v644_v1  ;;  %584 = vmatprep.mubr.msk.f32.mxu1 %vm645_vm0, %v644_v1  ;;  %v51_v7 = vld [vmem:[#allocation3 + $0x50] sm:$0xff]  ;;  %v50_v8 = vld [vmem:[#allocation3 + $0x48] sm:$0xff]  ;;  %v49_v9 = vld [vmem:[#allocation3 + $0x40] sm:$0xff] }
  0x14   :  { %518 = vmatpush3.msra.mxu0 %v56_v2  ;;  %553 = vmatpush3.msra.mxu1 %v56_v2  ;;  %v48_v10 = vld [vmem:[#allocation3 + $0x38] sm:$0xff]  ;;  %v47_v11 = vld [vmem:[#allocation3 + $0x30] sm:$0xff]  ;;  %v46_v12 = vld [vmem:[#allocation3 + $0x28] sm:$0xff] }
  0x15   :  { %519 = vmatprep.subr.mxu0 %v644_v1  ;;  %554 = vmatprep.subr.mxu1 %v644_v1  ;;  %v45_v13 = vld [vmem:[#allocation3 + $0x20] sm:$0xff]  ;;  %v44_v14 = vld [vmem:[#allocation3 + $0x18] sm:$0xff]  ;;  %v43_v15 = vld [vmem:[#allocation3 + $0x10] sm:$0xff] }
  0x16   :  { %520 = vmatpush3.msra.mxu0 %v55_v3  ;;  %555 = vmatpush3.msra.mxu1 %v55_v3  ;;  %v42_v16 = vld [vmem:[#allocation3 + $0x8] sm:$0xff]  ;;  %v41_v17 = vld [vmem:[#allocation3] sm:$0xff]  ;;  %v232_v19 = vld [vmem:[%s932_s2 + $0xf8] sm:$0xff] }
  0x17   :  { %521 = vmatprep.subr.mxu0 %v644_v1  ;;  %556 = vmatprep.subr.mxu1 %v644_v1  ;;  %v40_v18 = vld [vmem:[%s930_s0] sm:$0xff]  ;;  %v231_v20 = vld [vmem:[%s932_s2 + $0xf0] sm:$0xff]  ;;  %v230_v21 = vld [vmem:[%s932_s2 + $0xe8] sm:$0xff] }
  0x18   :  { %522 = vmatpush3.msra.mxu0 %v54_v4  ;;  %557 = vmatpush3.msra.mxu1 %v54_v4  ;;  %v229_v22 = vld [vmem:[%s932_s2 + $0xe0] sm:$0xff]  ;;  %v228_v23 = vld [vmem:[%s932_s2 + $0xd8] sm:$0xff]  ;;  %v227_v24 = vld [vmem:[%s932_s2 + $0xd0] sm:$0xff] }
  0x19   :  { %523 = vmatprep.subr.mxu0 %v644_v1  ;;  %558 = vmatprep.subr.mxu1 %v644_v1  ;;  %v226_v25 = vld [vmem:[%s932_s2 + $0xc8] sm:$0xff]  ;;  %v225_v26 = vld [vmem:[%s932_s2 + $0xc0] sm:$0xff]  ;;  %v224_v27 = vld [vmem:[%s932_s2 + $0xb8] sm:$0xff] }
  0x1a   :  { %524 = vmatpush3.msra.mxu0 %v53_v5  ;;  %559 = vmatpush3.msra.mxu1 %v53_v5  ;;  %v223_v28 = vld [vmem:[%s932_s2 + $0xb0] sm:$0xff]  ;;  %v222_v29 = vld [vmem:[%s932_s2 + $0xa8] sm:$0xff]  ;;  %v221_v30 = vld [vmem:[%s932_s2 + $0xa0] sm:$0xff] }
  0x1b   :  { %525 = vmatprep.subr.mxu0 %v644_v1  ;;  %560 = vmatprep.subr.mxu1 %v644_v1  ;;  %v220_v31 = vld [vmem:[%s932_s2 + $0x98] sm:$0xff]  ;;  %v219_v36 = vld [vmem:[%s932_s2 + $0x90] sm:$0xff]  ;;  %v218_v37 = vld [vmem:[%s932_s2 + $0x88] sm:$0xff] }
  0x1c   :  { %526 = vmatpush3.msra.mxu0 %v52_v6  ;;  %561 = vmatpush3.msra.mxu1 %v52_v6  ;;  %v217_v38 = vld [vmem:[%s932_s2 + $0x80] sm:$0xff]  ;;  %v216_v39 = vld [vmem:[%s932_s2 + $0x78] sm:$0xff]  ;;  %v215_v40 = vld [vmem:[%s932_s2 + $0x70] sm:$0xff] }
  0x1d   :  { %527 = vmatprep.subr.mxu0 %v644_v1  ;;  %562 = vmatprep.subr.mxu1 %v644_v1  ;;  %v214_v41 = vld [vmem:[%s932_s2 + $0x68] sm:$0xff]  ;;  %v213_v42 = vld [vmem:[%s932_s2 + $0x60] sm:$0xff]  ;;  %v212_v43 = vld [vmem:[%s932_s2 + $0x58] sm:$0xff] }
  0x1e   :  { %528 = vmatpush3.msra.mxu0 %v51_v7  ;;  %563 = vmatpush3.msra.mxu1 %v51_v7  ;;  %v211_v44 = vld [vmem:[%s932_s2 + $0x50] sm:$0xff]  ;;  %v210_v45 = vld [vmem:[%s932_s2 + $0x48] sm:$0xff]  ;;  %v209_v46 = vld [vmem:[%s932_s2 + $0x40] sm:$0xff] }
  0x1f   :  { %529 = vmatprep.subr.mxu0 %v644_v1  ;;  %564 = vmatprep.subr.mxu1 %v644_v1  ;;  %v208_v47 = vld [vmem:[%s932_s2 + $0x38] sm:$0xff]  ;;  %v207_v48 = vld [vmem:[%s932_s2 + $0x30] sm:$0xff]  ;;  %v206_v49 = vld [vmem:[%s932_s2 + $0x28] sm:$0xff] }
  0x20   :  { %530 = vmatpush3.msra.mxu0 %v50_v8  ;;  %565 = vmatpush3.msra.mxu1 %v50_v8  ;;  %v205_v50 = vld [vmem:[%s932_s2 + $0x20] sm:$0xff]  ;;  %v204_v51 = vld [vmem:[%s932_s2 + $0x18] sm:$0xff]  ;;  %v203_v52 = vld [vmem:[%s932_s2 + $0x10] sm:$0xff] }
  0x21   :  { %531 = vmatprep.subr.mxu0 %v644_v1  ;;  %566 = vmatprep.subr.mxu1 %v644_v1  ;;  %v202_v53 = vld [vmem:[%s932_s2 + $0x8] sm:$0xff]  ;;  %v201_v54 = vld [vmem:[%s932_s2] sm:$0xff]  ;;  %v349_v55 = vld [vmem:[%s934_s4 + $0xf8] sm:$0xff] }
  0x22   :  { %532 = vmatpush3.msra.mxu0 %v49_v9  ;;  %567 = vmatpush3.msra.mxu1 %v49_v9  ;;  %v333_v56 = vld [vmem:[%s934_s4 + $0x78] sm:$0xff]  ;;  %v348_v57 = vld [vmem:[%s934_s4 + $0xf0] sm:$0xff]  ;;  %v347_v59 = vld [vmem:[%s934_s4 + $0xe8] sm:$0xff] }
  0x23   :  { %533 = vmatprep.subr.mxu0 %v644_v1  ;;  %568 = vmatprep.subr.mxu1 %v644_v1  ;;  %v332_v58 = vld [vmem:[%s934_s4 + $0x70] sm:$0xff]  ;;  %v331_v60 = vld [vmem:[%s934_s4 + $0x68] sm:$0xff]  ;;  %v346_v61 = vld [vmem:[%s934_s4 + $0xe0] sm:$0xff] }
  0x24   :  { %534 = vmatpush3.msra.mxu0 %v48_v10  ;;  %569 = vmatpush3.msra.mxu1 %v48_v10  ;;  %v330_v62 = vld [vmem:[%s934_s4 + $0x60] sm:$0xff]  ;;  %v345_v63 = vld [vmem:[%s934_s4 + $0xd8] sm:$0xff]  ;;  %v328_v2 = vld [vmem:[%s934_s4 + $0x50] sm:$0xff] }
  0x25   :  { %535 = vmatprep.subr.mxu0 %v644_v1  ;;  %570 = vmatprep.subr.mxu1 %v644_v1  ;;  %v329_v0 = vld [vmem:[%s934_s4 + $0x58] sm:$0xff]  ;;  %v343_v3 = vld [vmem:[%s934_s4 + $0xc8] sm:$0xff]  ;;  %v342_v5 = vld [vmem:[%s934_s4 + $0xc0] sm:$0xff] }
  0x26   :  { %536 = vmatpush3.msra.mxu0 %v47_v11  ;;  %571 = vmatpush3.msra.mxu1 %v47_v11  ;;  %v327_v4 = vld [vmem:[%s934_s4 + $0x48] sm:$0xff]  ;;  %v326_v6 = vld [vmem:[%s934_s4 + $0x40] sm:$0xff]  ;;  %v341_v7 = vld [vmem:[%s934_s4 + $0xb8] sm:$0xff] }
  0x27   :  { %537 = vmatprep.subr.mxu0 %v644_v1  ;;  %572 = vmatprep.subr.mxu1 %v644_v1  ;;  %v325_v8 = vld [vmem:[%s934_s4 + $0x38] sm:$0xff]  ;;  %v340_v9 = vld [vmem:[%s934_s4 + $0xb0] sm:$0xff]  ;;  %v339_v11 = vld [vmem:[%s934_s4 + $0xa8] sm:$0xff] }
  0x28   :  { %538 = vmatpush3.msra.mxu0 %v46_v12  ;;  %573 = vmatpush3.msra.mxu1 %v46_v12  ;;  %v324_v10 = vld [vmem:[%s934_s4 + $0x30] sm:$0xff]  ;;  %v323_v12 = vld [vmem:[%s934_s4 + $0x28] sm:$0xff] }
  0x29   :  { %539 = vmatprep.subr.mxu0 %v644_v1  ;;  %574 = vmatprep.subr.mxu1 %v644_v1 }
  0x2a   :  { %540 = vmatpush3.msra.mxu0 %v45_v13  ;;  %575 = vmatpush3.msra.mxu1 %v45_v13  ;;  %v338_v13 = vld [vmem:[%s934_s4 + $0xa0] sm:$0xff] }
  0x2b   :  { %541 = vmatprep.subr.mxu0 %v644_v1  ;;  %576 = vmatprep.subr.mxu1 %v644_v1 }
  0x2c   :  { %542 = vmatpush3.msra.mxu0 %v44_v14  ;;  %577 = vmatpush3.msra.mxu1 %v44_v14  ;;  %v322_v14 = vld [vmem:[%s934_s4 + $0x20] sm:$0xff] }
  0x2d   :  { %543 = vmatprep.subr.mxu0 %v644_v1  ;;  %578 = vmatprep.subr.mxu1 %v644_v1 }
  0x2e   :  { %544 = vmatpush3.msra.mxu0 %v43_v15  ;;  %579 = vmatpush3.msra.mxu1 %v43_v15 }
  0x2f   :  { %545 = vmatprep.subr.mxu0 %v644_v1  ;;  %580 = vmatprep.subr.mxu1 %v644_v1 }
  0x30   :  { %546 = vmatpush3.msra.mxu0 %v42_v16  ;;  %581 = vmatpush3.msra.mxu1 %v42_v16 }
  0x31   :  { %547 = vmatprep.subr.mxu0 %v644_v1  ;;  %582 = vmatprep.subr.mxu1 %v644_v1 }
  0x32   :  { %548 = vmatpush3.msra.mxu0 %v41_v17  ;;  %583 = vmatpush3.msra.mxu1 %v41_v17 }
  0x33   :  { %550 = vmatmul.mubr.f32.vlgmr.msra.gmra.mxu0 %v40_v18  ;;  %245 = vmatprep.subr.mxu0 %v232_v19 }
  0x34   :  { %309 = vmatprep.mubr.f32.mxu0 %v644_v1  ;;  %246 = vmatpush1.msra.mxu0 %v231_v20  ;;  %v344_v1 = vld [vmem:[%s934_s4 + $0xd0] sm:$0xff]  ;;  %v337_v20 = vld [vmem:[%s934_s4 + $0x98] sm:$0xff] }
  0x35   :  { %247 = vmatprep.subr.mxu0 %v230_v21  ;;  %482 = vmatprep.subr.mxu1 %v349_v55  ;;  %v321_v21 = vld [vmem:[%s934_s4 + $0x18] sm:$0xff] }
  0x36   :  { %248 = vmatpush1.msra.mxu0 %v229_v22  ;;  %v336_v22 = vld [vmem:[%s934_s4 + $0x90] sm:$0xff] }
  0x37   :  { %249 = vmatprep.subr.mxu0 %v228_v23  ;;  %v320_v23 = vld [vmem:[%s934_s4 + $0x10] sm:$0xff] }
  0x38   :  { %250 = vmatpush1.msra.mxu0 %v227_v24  ;;  %v335_v24 = vld [vmem:[%s934_s4 + $0x88] sm:$0xff] }
  0x39   :  { %251 = vmatprep.subr.mxu0 %v226_v25  ;;  %v319_v25 = vld [vmem:[%s934_s4 + $0x8] sm:$0xff] }
  0x3a   :  { %252 = vmatpush1.msra.mxu0 %v225_v26  ;;  %v334_v26 = vld [vmem:[%s934_s4 + $0x80] sm:$0xff] }
  0x3b   :  { %253 = vmatprep.subr.mxu0 %v224_v27  ;;  %v318_v27 = vld [vmem:[%s934_s4] sm:$0xff]  ;;  %s647_s4 = smov [#allocation6]  }
  0x3c   :  { %254 = vmatpush1.msra.mxu0 %v223_v28  ;;  %v447_v28 = vld [vmem:[#allocation2] ss:$0 sm:$0xff]  ;;  %s438_s24 = sshll.u32 %s647_s4, 4  ;;  %s439_s24 = int_to_ptr.vmem [resolvable:$true] %s438_s24 }
  0x3d   :  { %255 = vmatprep.subr.mxu0 %v222_v29  ;;  %v646_v29 = vmov 0   ;;  %p622_p6 = scmp.lt.s32.totalorder %s439_s24, %s439_s24 }
  0x3e   :  { %256 = vmatpush1.msra.mxu0 %v221_v30  ;;  %594 = vset.pattern.permute.xlu0 %v646_v29  ;;  %v235_v30 = vlaneseq }
  0x3f   :  { %257 = vmatprep.subr.mxu0 %v220_v31  ;;  %357 = vperm.xlu0 %594, %v447_v28  }
  0x40   :  { %258 = vmatpush1.msra.mxu0 %v219_v36  ;;  %v236_v31 = vshrl.u32 %v235_v30, 7 }
  0x41   :  { %259 = vmatprep.subr.mxu0 %v218_v37 }
  0x42   :  { %260 = vmatpush1.msra.mxu0 %v217_v38 }
  0x43   :  { %261 = vmatprep.subr.mxu0 %v216_v39 }
  0x44   :  { %262 = vmatpush1.msra.mxu0 %v215_v40 }
  0x45   :  { %263 = vmatprep.subr.mxu0 %v214_v41 }
  0x46   :  { %264 = vmatpush1.msra.mxu0 %v213_v42 }
  0x47   :  { %265 = vmatprep.subr.mxu0 %v212_v43 }
  0x48   :  { %266 = vmatpush1.msra.mxu0 %v211_v44 }
  0x49   :  { %267 = vmatprep.subr.mxu0 %v210_v45 }
  0x4a   :  { %268 = vmatpush1.msra.mxu0 %v209_v46 }
  0x4b   :  { %269 = vmatprep.subr.mxu0 %v208_v47 }
  0x4c   :  { %270 = vmatpush1.msra.mxu0 %v207_v48 }
  0x4d   :  { %271 = vmatprep.subr.mxu0 %v206_v49 }
  0x4e   :  { %272 = vmatpush1.msra.mxu0 %v205_v50 }
  0x4f   :  { %273 = vmatprep.subr.mxu0 %v204_v51 }
  0x50   :  { %274 = vmatpush1.msra.mxu0 %v203_v52 }
  0x51   :  { %275 = vmatprep.subr.mxu0 %v202_v53 }
  0x52   :  { %276 = vmatpush1.msra.mxu0 %v201_v54 }
  0xba   :  { %v358_v45 = vpop.permute.xlu0 %357 }
  0xf3   :  { %v123_v32 = vpop.f32.mrf.mxu0 }
  0xf4   :  { %v766_v33 = vsub.f32 %v40_v18, %v123_v32  ;;  %v237_v32 = vsub.s32 0, %v236_v31 }
  0xf5   :  { %v551_v34 = vpop.f32.mrf.mxu0 }
  0xf6   :  { %v128_v35 = vmul.f32 %v766_v33, %v766_v33  ;;  %v241_v34 = vsub.s32 1, %v236_v31 }
  0xf8   :  { %585 = vmatmul.mubr.f32.vlgmr.msra.gmra.mxu1 %v128_v35 }
  0xf9   :  { %483 = vmatpush3.msra.mxu1 %v333_v56 }
  0xfa   :  { %484 = vmatprep.subr.mxu1 %v348_v57 }
  0xfb   :  { %485 = vmatpush3.msra.mxu1 %v332_v58 }
  0xfc   :  { %486 = vmatprep.subr.mxu1 %v347_v59 }
  0xfd   :  { %487 = vmatpush3.msra.mxu1 %v331_v60 }
  0xfe   :  { %488 = vmatprep.subr.mxu1 %v346_v61 }
  0xff   :  { %489 = vmatpush3.msra.mxu1 %v330_v62 }
 0x100   :  { %490 = vmatprep.subr.mxu1 %v345_v63 }
 0x101   :  { %491 = vmatpush3.msra.mxu1 %v329_v0 }
 0x102   :  { %492 = vmatprep.subr.mxu1 %v344_v1 }
 0x103   :  { %493 = vmatpush3.msra.mxu1 %v328_v2 }
 0x104   :  { %494 = vmatprep.subr.mxu1 %v343_v3 }
 0x105   :  { %495 = vmatpush3.msra.mxu1 %v327_v4 }
 0x106   :  { %496 = vmatprep.subr.mxu1 %v342_v5 }
 0x107   :  { %497 = vmatpush3.msra.mxu1 %v326_v6 }
 0x108   :  { %498 = vmatprep.subr.mxu1 %v341_v7 }
 0x109   :  { %499 = vmatpush3.msra.mxu1 %v325_v8 }
 0x10a   :  { %500 = vmatprep.subr.mxu1 %v340_v9 }
 0x10b   :  { %501 = vmatpush3.msra.mxu1 %v324_v10 }
 0x10c   :  { %502 = vmatprep.subr.mxu1 %v339_v11 }
 0x10d   :  { %503 = vmatpush3.msra.mxu1 %v323_v12 }
 0x10e   :  { %504 = vmatprep.subr.mxu1 %v338_v13 }
 0x10f   :  { %505 = vmatpush3.msra.mxu1 %v322_v14 }
 0x110   :  { %506 = vmatprep.subr.mxu1 %v337_v20 }
 0x111   :  { %507 = vmatpush3.msra.mxu1 %v321_v21 }
 0x112   :  { %508 = vmatprep.subr.mxu1 %v336_v22 }
 0x113   :  { %509 = vmatpush3.msra.mxu1 %v320_v23 }
 0x114   :  { %510 = vmatprep.subr.mxu1 %v335_v24 }
 0x115   :  { %511 = vmatpush3.msra.mxu1 %v319_v25 }
 0x116   :  { %512 = vmatprep.subr.mxu1 %v334_v26 }
 0x117   :  { %513 = vmatpush3.msra.mxu1 %v318_v27 }
 0x1b8   :  { %v195_v15 = vpop.f32.mrf.mxu1 }
 0x1b9   :  { %v196_v16 = vadd.f32 1e-05, %v195_v15 }
 0x1ba   :  { %v586_v17 = vpop.f32.mrf.mxu1 }
 0x1bb   :  { %595 = vrsqrt.f32 %v196_v16 }
 0x1c8   :  { %v596_v18 = vpop.eup %595 }
 0x1c9   :  { %v200_v19 = vmul.f32 %v596_v18, %v766_v33  ;;  %v233_v33 = vld [vmem:[%s933_s3] sm:$0x3]  ;;  %s617_s3 = scalar_lea.vmem %s439_s24, 128 }
 0x1ca   :  { %v238_v35 = vrot.slane %v233_v33, %v237_v32  ;;  %v242_v36 = vrot.slane %v233_v33, %v241_v34  ;;  %p618_p5 = scmp.ne.s32.totalorder %s439_s24, %s617_s3  ;;  %p623_p7 = scmp.lt.s32.totalorder %s617_s3, %s617_s3 }
 0x1cb   :  { %310 = vmatmul.mubr.f32.vlgmr.msra.gmra.mxu0 %v200_v19 }
 0x1cc   :  { %p624_p8 = por %p623_p7, %p622_p6 }
 0x1ce   :  { %p625_p9 = pnand %p624_p8, %p618_p5 }
 0x28b   :  { %v311_v37 = vpop.f32.mrf.mxu0 }
 0x28c   :  { %v312_v38 = vadd.f32 %v311_v37, %v238_v35 }
 0x28d   :  { %v313_v39 = vpop.f32.mrf.mxu0 }
 0x28e   :  { %v314_v40 = vadd.f32 %v313_v39, %v242_v36  ;;  %v316_v42 = vmax.f32 %v312_v38, 0.0 }
 0x290   :  { %v317_v41 = vmax.f32 %v314_v40, 0.0 }
 0x292   :  { %424 = vmatprep.mubr.f32.mxu1 %v317_v41 }
 0x293   :  { %425 = vmatmul.mubr.f32.vlgmr.msra.gmra.mxu1 %v316_v42 }
 0x353   :  { %v514_v43 = vpop.f32.mrf.mxu1 }
 0x355   :  { %v515_v44 = vpop.f32.mrf.mxu1 }
 0x356   :  { %v516_v46 = vadd.f32 %v515_v44, %v514_v43 }
 0x358   :  { %v427_v47 = vadd.f32 %v516_v46, %v358_v45 }
 0x35a   :  { %431 = vst.msk [vmem:[#allocation6] sm:$0xff] %vm430_vm1, %v427_v47 }
 0x35b   :  { %628 = shalt.err (!%p625_p9)
}
 0x35c   :  { %441 = dma.vmem_to_hbm [thread:$0]  %s439_s24, 128, %s936_s6, [#allocation5]  }
 0x35d   :  { %639 = dma.done.wait [#allocation5], 128  }
 0x35e   :  { %640 = vsyncadd [#allocation5], 4294967168 }
 0x35f   :  { %445 = vsyncpa [#allocation4], 1 }
 0x360   :  { %446 = vsyncpa [#allocation5], 1 }

</bundles_post_ra>
